<compile_context>
chip_gen: v7x
topology: tpu7x:2x2x1
jax: 0.10.0
libtpu: 0.0.40
codegen_flags: <defaults>
</compile_context>

<pallas_src>
import jax
import jax.numpy as jnp
from jax import lax
from jax.experimental import pallas as pl
from jax.experimental.pallas import tpu as pltpu


# --------------------------------------------------------------------------
# Tiling helpers
# --------------------------------------------------------------------------
def _vmem_budget():
    """Generation-aware VMEM budget for the pipelined working set plus the
    scoped-VMEM limit to request from the compiler."""
    try:
        cap = int(pltpu.get_tpu_info().vmem_capacity_bytes)
    except Exception:
        cap = 64 << 20                    # v7x physical VMEM: safe everywhere
    budget = (cap * 3) // 5               # ~60%: ~76 MiB on v5e/v6e, ~38 MiB on v7x
    vmem_limit = min(cap, budget + (16 << 20))
    return budget, vmem_limit


def _pick_tile(batch, hw, channels, elem_bytes):
    """Pick the spatial (lane) tile for one FPN level.

    Returns (tile, padded_hw, vmem_limit_bytes)."""
    budget, vmem_limit = _vmem_budget()

    # Sublane-padded channel rows of the input block: 8 rows for 4-byte,
    # 16 for 2-byte, 32 for 1-byte dtypes.
    sub = {4: 8, 2: 16, 1: 32}.get(elem_bytes, 8)
    c_pad = pl.cdiv(channels, sub) * sub
    # Per 128-lane unit: double-buffered input block + three double-buffered
    # (8-row sublane-padded) 4-byte output blocks.
    per_unit = 2 * (c_pad * elem_bytes + 3 * 8 * 4) * 128
    budget_units = max(1, budget // per_unit)

    if hw % 128 != 0 and hw <= budget_units * 128:
        # Full-extent lane block (exempt from the 128-lane divisibility rule):
        # avoids an XLA pad copy on small / ragged levels.
        return hw, hw, vmem_limit

    hw_units = pl.cdiv(hw, 128)
    units = max(1, min(hw_units, budget_units, 16384 // 128))
    # v7x megacore (2 TCs): keep enough parallel grid blocks so the grid
    # actually shards across both cores.  No effect on v5e/v6e.
    target_blocks = min(4, batch * hw_units)
    while units > 1 and batch * pl.cdiv(hw_units, units) < target_blocks:
        units = max(1, units // 2)
    tile = units * 128
    return tile, pl.cdiv(hw, tile) * tile, vmem_limit


# --------------------------------------------------------------------------
# Pallas kernel: per (batch, spatial-tile) block of one FPN level.
# --------------------------------------------------------------------------
def _make_filter_kernel(num_channels, lo, hi, threshold):
    """Build the kernel for static (C, idx_range, threshold)."""
    full_range = (lo == 0 and hi == num_channels)

    def kernel(cls_ref, val_ref, id_ref, keep_ref):
        # cls_ref block: (1, C, tile) in the model's native dtype.
        cls = cls_ref[0].astype(jnp.float32)                 # (C, tile)
        ch = lax.broadcasted_iota(jnp.int32, cls.shape, 0)   # channel ids
        if not full_range:
            # Restrict the compared channels without any HBM copy / ref slice.
            in_range = (ch >= lo) & (ch < hi)
            cls = jnp.where(in_range, cls, -jnp.inf)

        # Channel max (cross-sublane reduce, XLU).
        maxval = jnp.max(cls, axis=0, keepdims=True)         # (1, tile) f32

        # First-index argmax (torch.max tie rule): min channel id among
        # positions equal to the max.
        cand = jnp.where(cls == maxval, ch, jnp.int32(num_channels))
        maxid = jnp.min(cand, axis=0, keepdims=True)         # (1, tile) i32
        # Clamp into the compared range (guards the NaN / all -inf edge case;
        # see correctness note in the module docstring).
        maxid = jnp.clip(maxid, lo, hi - 1)

        # Threshold keep-mask computed in-kernel (free VPU work under the
        # DMA bound) so no post-pass re-reads maxval from HBM.
        keep = (maxval >= jnp.float32(threshold)).astype(jnp.int32)

        val_ref[0] = maxval
        id_ref[0] = maxid
        keep_ref[0] = keep

    return kernel


def _level_filter(cls_flat, lo, hi, threshold):
    """Run the filter kernel for one FPN level.

    cls_flat: (B, C, HW) in the model's dtype (free reshape of NCHW input).
    Returns (maxval (B, HW) f32, maxid (B, HW) i32, mask (B, HW) bool).
    """
    B, C, HW = cls_flat.shape
    elem = jnp.dtype(cls_flat.dtype).itemsize
    tile, HWp, vmem_limit = _pick_tile(B, HW, C, elem)
    if HWp != HW:
        cls_flat = jnp.pad(cls_flat, ((0, 0), (0, 0), (0, HWp - HW)))

    grid = (B, HWp // tile)
    kernel = _make_filter_kernel(C, lo, hi, threshold)

    val, mid, keep = pl.pallas_call(
        kernel,
        out_shape=(
            jax.ShapeDtypeStruct((B, 1, HWp), jnp.float32),
            jax.ShapeDtypeStruct((B, 1, HWp), jnp.int32),
            jax.ShapeDtypeStruct((B, 1, HWp), jnp.int32),
        ),
        grid=grid,
        in_specs=[pl.BlockSpec((1, C, tile), lambda b, j: (b, 0, j))],
        out_specs=(
            pl.BlockSpec((1, 1, tile), lambda b, j: (b, 0, j)),
            pl.BlockSpec((1, 1, tile), lambda b, j: (b, 0, j)),
            pl.BlockSpec((1, 1, tile), lambda b, j: (b, 0, j)),
        ),
        compiler_params=pltpu.CompilerParams(
            dimension_semantics=("parallel", "parallel"),
            vmem_limit_bytes=vmem_limit),
        cost_estimate=pl.CostEstimate(
            flops=3 * B * C * HWp,
            transcendentals=0,
            bytes_accessed=B * HWp * (C * elem + 3 * 4)),
    )(cls_flat)

    maxval = val[:, 0, :HW]
    maxid = mid[:, 0, :HW]
    mask = keep[:, 0, :HW] != 0
    return maxval, maxid, mask


# --------------------------------------------------------------------------
# Module wrapper (glue in plain JAX)
# --------------------------------------------------------------------------
class FCOSMultiStrideFilterPallas:
    """JAX/Pallas port of hat FCOSMultiStrideFilter.

    forward(preds) with preds = (cls_scores, bbox_preds, centernesses), each a
    per-level list of NCHW arrays.  Per level / per image the dense output is
      [max_value (HW,), max_id (HW,), coord (HW, 2) as (h, w),
       score (C, HW) view, bbox_pred (4, HW) view, centerness (1, HW) view,
       keep_mask (HW,)]
    (score/bbox/centerness stay channel-first — zero-cost views; the
    transpose is deferred to `gather_kept`, which applies the keep mask and
    only transposes the kept rows, reproducing the torch FilterModule's
    dynamic-length outputs exactly.)

    Correctness note: if a score is NaN, torch.max would return NaN plus the
    NaN's index; here maxid is clamped into the compared range instead.  The
    keep comparison uses `>=` ("lower bound" semantics of the threshold).
    """

    def __init__(self, strides, threshold, idx_range=None, for_compile=False,
                 decoder=None):
        self.strides = tuple(strides)
        self.num_level = len(strides)
        self.threshold = float(threshold)
        self.idx_range = idx_range
        self.for_compile = for_compile
        self.decoder = decoder  # TODO(synk): decoder module not provided; not ported.

    def __call__(self, preds):
        cls_scores, bbox_preds, centernesses = preds
        mlvl_outputs = []
        for level in range(self.num_level):
            cls = cls_scores[level]
            bbox = bbox_preds[level]
            ctr = centernesses[level]
            B, C, H, W = cls.shape
            HW = H * W
            lo, hi = (0, C) if self.idx_range is None else self.idx_range

            # Free (contiguous) reshape — streamed into the kernel as-is, in
            # its native dtype; idx_range restriction happens in-kernel.
            cls_flat = cls.reshape(B, C, HW)
            maxval, maxid, mask = _level_filter(cls_flat, lo, hi,
                                                self.threshold)

            # Static coordinates, shared across the batch.
            flat = jnp.arange(HW, dtype=jnp.int32)
            coord = jnp.stack([flat // W, flat % W], axis=1)      # (HW, 2)

            # Channel-first views — zero-cost; transpose deferred to
            # gather_kept (after masking) to avoid full-tensor XLA transposes.
            score_chw = cls_flat                                  # (B, C, HW)
            bbox_chw = bbox.reshape(B, 4, HW)                     # (B, 4, HW)
            ctr_chw = ctr.reshape(B, 1, HW)                       # (B, 1, HW)

            per_sample_outs = []
            for b in range(B):
                per_sample_outs.append([
                    maxval[b],        # (HW,)
                    maxid[b],         # (HW,)
                    coord,            # (HW, 2) (h, w), batch-replicated
                    score_chw[b],     # (C, HW) view
                    bbox_chw[b],      # (4, HW) view
                    ctr_chw[b],       # (1, HW) view
                    mask[b],          # (HW,) keep mask
                ])
            mlvl_outputs.append(per_sample_outs)

        # TODO(synk): threshold-based variable-length compaction (dynamic
        # n_kept output shapes of torch.ops.horizon.filter) is not expressible
        # with fixed-shape Pallas/TPU outputs; dense tensors + keep mask are
        # returned here, and `gather_kept` performs the compaction eagerly.
        if self.for_compile:
            return tuple(mlvl_outputs[i][0] for i in range(len(mlvl_outputs)))
        return mlvl_outputs

    @staticmethod
    def gather_kept(per_sample_out):
        """Eager post-process mirroring torch.ops.horizon.filter: apply the
        keep mask, then transpose only the kept rows.  Requires concrete
        (non-traced) arrays since the output length is data dependent."""
        maxval, maxid, coord, score_chw, bbox_chw, ctr_chw, mask = per_sample_out
        idx = jnp.nonzero(mask)[0]
        return [
            maxval[idx],              # (n,)
            maxid[idx],               # (n,)
            coord[idx],               # (n, 2)
            score_chw[:, idx].T,      # (n, C)
            bbox_chw[:, idx].T,       # (n, 4)
            ctr_chw[:, idx].T,        # (n, 1)
        ]


# --------------------------------------------------------------------------
# Demo / self-check
# --------------------------------------------------------------------------
if __name__ == "__main__":
    key = jax.random.PRNGKey(0)
    strides = (8, 16, 32)
    num_classes = 4
    batch = 2
    spatials = (16, 8, 4)          # H = W per level
    threshold = 0.5
    idx_range = (1, 3)             # exercise the idx_range path

    cls_scores, bbox_preds, centernesses = [], [], []
    for s in spatials:
        key, k1, k2, k3 = jax.random.split(key, 4)
        cls_scores.append(jax.random.uniform(k1, (batch, num_classes, s, s),
                                             dtype=jnp.float32))
        bbox_preds.append(jax.random.uniform(k2, (batch, 4, s, s),
                                             dtype=jnp.float32) * 32.0)
        centernesses.append(jax.random.uniform(k3, (batch, 1, s, s),
                                               dtype=jnp.float32))

    module = FCOSMultiStrideFilterPallas(strides=strides, threshold=threshold,
                                         idx_range=idx_range)
    outputs = module((cls_scores, bbox_preds, centernesses))
    jax.block_until_ready(outputs)

    # Verify the kernel against a pure-JAX reference.
    lo, hi = idx_range
    for level, s in enumerate(spatials):
        HW = s * s
        cls = cls_scores[level]
        bbox = bbox_preds[level]
        ctr = centernesses[level]
        sel = cls[:, lo:hi].reshape(batch, hi - lo, HW)
        ref_maxval = jnp.max(sel, axis=1)
        ref_maxid = jnp.argmax(sel, axis=1).astype(jnp.int32) + lo
        ref_mask = ref_maxval >= threshold
        flat = jnp.arange(HW, dtype=jnp.int32)
        ref_coord = jnp.stack([flat // s, flat % s], axis=1)      # (HW, 2)
        for b in range(batch):
            out = outputs[level][b]
            # Dense kernel outputs.
            assert jnp.allclose(out[0], ref_maxval[b], atol=1e-6)
            assert jnp.array_equal(out[1], ref_maxid[b])
            assert jnp.array_equal(out[2], ref_coord)
            assert jnp.allclose(out[3], cls[b].reshape(num_classes, HW))
            assert jnp.allclose(out[4], bbox[b].reshape(4, HW))
            assert jnp.allclose(out[5], ctr[b].reshape(1, HW))
            assert jnp.array_equal(out[6], ref_mask[b])
            # Torch-style compacted outputs (dynamic length, eager gather).
            kept = FCOSMultiStrideFilterPallas.gather_kept(out)
            sel_idx = jnp.nonzero(ref_mask[b])[0]
            assert jnp.allclose(kept[0], ref_maxval[b][sel_idx], atol=1e-6)
            assert jnp.array_equal(kept[1], ref_maxid[b][sel_idx])
            assert jnp.array_equal(kept[2], ref_coord[sel_idx])
            assert jnp.allclose(kept[3],
                                cls[b].reshape(num_classes, HW)[:, sel_idx].T)
            assert jnp.allclose(kept[4], bbox[b].reshape(4, HW)[:, sel_idx].T)
            assert jnp.allclose(kept[5], ctr[b].reshape(1, HW)[:, sel_idx].T)

    print("KERNEL_OK")
</pallas_src>

<mosaic_0001>
module attributes {stable_mosaic.version = 11 : i64} {
  func.func @kernel(%arg0: i32, %arg1: i32, %arg2: memref<1x4x128xf32, #tpu.memory_space<vmem>>, %arg3: memref<1x1x128xf32, #tpu.memory_space<vmem>>, %arg4: memref<1x1x128xi32, #tpu.memory_space<vmem>>, %arg5: memref<1x1x128xi32, #tpu.memory_space<vmem>>) attributes {dimension_semantics = [#tpu.dimension_semantics<parallel>, #tpu.dimension_semantics<parallel>], iteration_bounds = array<i64: 2, 2>, scalar_prefetch = 0 : i64, scratch_operands = 0 : i64, tpu.core_type = #tpu.core_type<tc>, window_params = [{transform_indices = @transform_0, window_bounds = array<i64: 1, 4, 128>}, {transform_indices = @transform_1, window_bounds = array<i64: 1, 1, 128>}, {transform_indices = @transform_2, window_bounds = array<i64: 1, 1, 128>}, {transform_indices = @transform_3, window_bounds = array<i64: 1, 1, 128>}]} {
    %c0 = arith.constant 0 : index
    %c0_0 = arith.constant 0 : index
    %c0_1 = arith.constant 0 : index
    %0 = vector.load %arg2[%c0, %c0_0, %c0_1] : memref<1x4x128xf32, #tpu.memory_space<vmem>>, vector<1x4x128xf32>
    %1 = vector.shape_cast %0 : vector<1x4x128xf32> to vector<4x128xf32>
    %2 = tpu.iota {dimensions = array<i32: 0>} : vector<4x128xi32>
    %c1_i32 = arith.constant 1 : i32
    %3 = vector.broadcast %c1_i32 : i32 to vector<4x128xi32>
    %4 = arith.cmpi sge, %2, %3 : vector<4x128xi32>
    %c3_i32 = arith.constant 3 : i32
    %5 = vector.broadcast %c3_i32 : i32 to vector<4x128xi32>
    %6 = arith.cmpi slt, %2, %5 : vector<4x128xi32>
    %7 = arith.andi %4, %6 : vector<4x128xi1>
    %cst = arith.constant 0xFF800000 : f32
    %8 = vector.broadcast %cst : f32 to vector<4x128xf32>
    %9 = arith.select %7, %1, %8 : vector<4x128xi1>, vector<4x128xf32>
    %cst_2 = arith.constant dense<0xFF800000> : vector<128xf32>
    %10 = vector.multi_reduction <maximumf>, %9, %cst_2 [0] : vector<4x128xf32> to vector<128xf32>
    %11 = vector.shape_cast %10 : vector<128xf32> to vector<1x128xf32>
    %12 = vector.broadcast %11 : vector<1x128xf32> to vector<4x128xf32>
    %13 = arith.cmpf oeq, %9, %12 : vector<4x128xf32>
    %c4_i32 = arith.constant 4 : i32
    %14 = vector.broadcast %c4_i32 : i32 to vector<4x128xi32>
    %15 = arith.select %13, %2, %14 : vector<4x128xi1>, vector<4x128xi32>
    %cst_3 = arith.constant dense<2147483647> : vector<128xi32>
    %16 = vector.multi_reduction <minsi>, %15, %cst_3 [0] : vector<4x128xi32> to vector<128xi32>
    %17 = vector.shape_cast %16 : vector<128xi32> to vector<1x128xi32>
    %c1_i32_4 = arith.constant 1 : i32
    %c2_i32 = arith.constant 2 : i32
    %18 = vector.broadcast %c1_i32_4 : i32 to vector<1x128xi32>
    %19 = arith.maxsi %18, %17 : vector<1x128xi32>
    %20 = vector.broadcast %c2_i32 : i32 to vector<1x128xi32>
    %21 = arith.minsi %20, %19 : vector<1x128xi32>
    %cst_5 = arith.constant 5.000000e-01 : f32
    %22 = vector.broadcast %cst_5 : f32 to vector<1x128xf32>
    %23 = arith.cmpf oge, %11, %22 : vector<1x128xf32>
    %24 = arith.extui %23 : vector<1x128xi1> to vector<1x128xi32>
    %c0_6 = arith.constant 0 : index
    %c0_7 = arith.constant 0 : index
    %c0_8 = arith.constant 0 : index
    %25 = vector.load %arg3[%c0_6, %c0_7, %c0_8] : memref<1x1x128xf32, #tpu.memory_space<vmem>>, vector<1x1x128xf32>
    %26 = vector.shape_cast %25 : vector<1x1x128xf32> to vector<1x128xf32>
    %27 = vector.shape_cast %11 : vector<1x128xf32> to vector<1x1x128xf32>
    tpu.vector_store %arg3[%c0_6, %c0_7, %c0_8], %27 {strides = array<i32>} : memref<1x1x128xf32, #tpu.memory_space<vmem>>, vector<1x1x128xf32>,
    %c0_9 = arith.constant 0 : index
    %c0_10 = arith.constant 0 : index
    %c0_11 = arith.constant 0 : index
    %28 = vector.load %arg4[%c0_9, %c0_10, %c0_11] : memref<1x1x128xi32, #tpu.memory_space<vmem>>, vector<1x1x128xi32>
    %29 = vector.shape_cast %28 : vector<1x1x128xi32> to vector<1x128xi32>
    %30 = vector.shape_cast %21 : vector<1x128xi32> to vector<1x1x128xi32>
    tpu.vector_store %arg4[%c0_9, %c0_10, %c0_11], %30 {strides = array<i32>} : memref<1x1x128xi32, #tpu.memory_space<vmem>>, vector<1x1x128xi32>,
    %c0_12 = arith.constant 0 : index
    %c0_13 = arith.constant 0 : index
    %c0_14 = arith.constant 0 : index
    %31 = vector.load %arg5[%c0_12, %c0_13, %c0_14] : memref<1x1x128xi32, #tpu.memory_space<vmem>>, vector<1x1x128xi32>
    %32 = vector.shape_cast %31 : vector<1x1x128xi32> to vector<1x128xi32>
    %33 = vector.shape_cast %24 : vector<1x128xi32> to vector<1x1x128xi32>
    tpu.vector_store %arg5[%c0_12, %c0_13, %c0_14], %33 {strides = array<i32>} : memref<1x1x128xi32, #tpu.memory_space<vmem>>, vector<1x1x128xi32>,
    return
  }
  func.func @transform_0(%arg0: i32, %arg1: i32) -> (i32, i32, i32) {
    %c0_i32 = arith.constant 0 : i32
    %c0_i32_0 = arith.constant 0 : i32
    return %arg0, %c0_i32, %arg1 : i32, i32, i32
  }
  func.func @transform_1(%arg0: i32, %arg1: i32) -> (i32, i32, i32) {
    %c0_i32 = arith.constant 0 : i32
    %c0_i32_0 = arith.constant 0 : i32
    return %arg0, %c0_i32, %arg1 : i32, i32, i32
  }
  func.func @transform_2(%arg0: i32, %arg1: i32) -> (i32, i32, i32) {
    %c0_i32 = arith.constant 0 : i32
    %c0_i32_0 = arith.constant 0 : i32
    return %arg0, %c0_i32, %arg1 : i32, i32, i32
  }
  func.func @transform_3(%arg0: i32, %arg1: i32) -> (i32, i32, i32) {
    %c0_i32 = arith.constant 0 : i32
    %c0_i32_0 = arith.constant 0 : i32
    return %arg0, %c0_i32, %arg1 : i32, i32, i32
  }
}

</mosaic_0001>

<bundles_post_ra>
// kernel: tpu_custom_call.1
= control target key start
LH: loop header
LB: loop body
LE: loop exit
PB: predicated region body
PF: predicated region fallthrough
CT: control target
= control target key end

     0   :  { %9 = vsyncpa [#allocation3], 0  ;;  %s1044_s0 = inlined_call_operand.hbm [shape: f32[2,4,256], index: 0, kind: input, shape index: {}]   ;;  %s1045_s1 = inlined_call_operand.hbm [shape: f32[2,1,256], index: 1, kind: output, shape index: {0}]   ;;  %s1046_s2 = inlined_call_operand.hbm [shape: s32[2,1,256], index: 2, kind: output, shape index: {1}]   ;;  %s1047_s3 = inlined_call_operand.hbm [shape: s32[2,1,256], index: 3, kind: output, shape index: {2}]  }
   0x1   :  { %11 = vsyncpa [#allocation3 + $0x1], 0 }
   0x2   :  { %12 = vsyncpa [#allocation4], 0 }
   0x3   :  { %14 = vsyncpa [#allocation4 + $0x1], 0 }
   0x4   :  { %15 = vsyncpa [#allocation7], 0 }
   0x5   :  { %17 = vsyncpa [#allocation7 + $0x1], 0  ;;  %s771_s12 = smov 0   ;;  %s773_s13 = smov 0  }
   0x6   :  { %s775_s14 = smov 0   ;;  %s777_s15 = smov 0  }
   0x7   :  { %s779_s16 = smov 0   ;;  %s781_s17 = smov 0  }
   0x8   :  { %s783_s18 = smov 0   ;;  %s785_s19 = smov 0  }
   0x9 LB: > { %s812_s20 = sadd.s32 4294967295, %s744_s19   ;;  %s1049_s21 = sadd.s32 4294967294, %s744_s19   ;;  %s744_s19 = sphi %s785_s19, %s23_s19   ;;  %s740_s18 = sphi %s783_s18, %s1069_s18   ;;  %s736_s17 = sphi %s781_s17, %s1068_s17   ;;  %s732_s16 = sphi %s779_s16, %s1067_s16   ;;  %s728_s15 = sphi %s777_s15, %s1066_s15   ;;  %s724_s14 = sphi %s775_s14, %s1065_s14   ;;  %s720_s13 = sphi %s773_s13, %s1064_s13   ;;  %s716_s12 = sphi %s771_s12, %s1063_s12  }
   0xa   : > { %s32_s22 = sadd.s32 1, %s736_s17  ;;  %s35_s23 = sadd.s32 1, %s740_s18 }
   0xb   : > { %p33_p0 = scmp.ge.s32.totalorder %s32_s22, 2  ;;  %s44_s24 = sadd.s32 1, %s724_s14 }
   0xc   : > { %p51_p1 = scmp.ne.s32.totalorder %s724_s14, %s720_s13  ;;  %p52_p2 = scmp.eq.s32.totalorder %s744_s19, 0 }
   0xd   : > { %s1071_s22 = smov (%p33_p0, %s32_s22), 0  ;;  %s1073_s23 = smov (!%p33_p0, %s35_s23), %s740_s18 }
   0xe   : > { %s40_s25 = ssub.s32 %s736_s17, %s1071_s22  ;;  %p826_p3 = por %p52_p2, %p51_p1 }
   0xf   : > { %p37_p4 = scmp.ge.s32.totalorder %s1073_s23, 2  ;;  %p57_p5 = scmp.ne.s32.totalorder %s720_s13, %s716_s12 }
  0x10   : > { %p58_p6 = scmp.eq.s32.totalorder %s812_s20, 0  ;;  %p83_p7 = scmp.eq.s32.totalorder %s812_s20, 3 }
  0x11   : > { %s1075_s23 = smov (%p37_p4, %s1073_s23), 0  ;;  %p89_p10 = scmp.eq.s32.totalorder %s1049_s21, 3 }
  0x12   : > { %1052 = sst [smem:[#allocation12_spill]] %s1075_s23  ;;  %p836_p8 = por %p58_p6, %p57_p5 }
  0x13   : > { %p840_p9 = por %p83_p7, %p51_p1  ;;  %s39_s29 = ssub.s32 %s740_s18, %s1075_s23 }
  0x14   : > { %s41_s30 = sor.u32 %s40_s25, %s39_s29  ;;  %p848_p12 = por %p89_p10, %p57_p5 }
  0x15   : > { %s1054_s28 = scalar_select %p840_p9, 1, 0 }
  0x16   : > { %p42_p11 = scmp.eq.s32.totalorder %s41_s30, 0  ;;  %p489_p13 = scmp.lt.s32.totalorder %s744_s19, 4 }
  0x17   : > { %s1055_s4 = scalar_select %p848_p12, 1, 0 }
  0x18   : > { %s165_s5 = sand.u32 1, %s724_s14   ;;  %s455_s8 = sshll.u32 %s740_s18, 1 }
  0x19   : > { %s855_s6 = scalar_select %p42_p11, %s724_s14, %s44_s24  }
  0x1a   : > { %s454_s7 = sshll.u32 %s165_s5, 2  ;;  %s174_s9 = sadd.s32 %s736_s17, %s455_s8 }
  0x1b   : > { %s169_s10 = scalar_lea.vmem [#allocation2], %s454_s7  ;;  %s456_s23 = sshll.u32 %s174_s9, 6 }
  0x1c   : > { %s178_s11 = sshll.u32 %s169_s10, 4  ;;  %s864_s29 = scalar_lea.hbm %s1044_s0, %s456_s23  ;;  %s859_s11 = int_to_ptr.vmem [resolvable:$true] %s178_s11 }
  0x1d   : > { %p868_p0 = pnand %p489_p13, %p826_p3  ;;  %s166_s30 = scalar_lea.sflag [#allocation3], %s165_s5 }
  0x1e   : > { %s556_s7 = scalar_lea.hbm %s864_s29, 64  ;;  %s561_s26 = scalar_lea.hbm %s1044_s0, 256 }
  0x1f   : > { %p557_p4 = scmp.ne.s32.totalorder %s864_s29, %s556_s7  ;;  %p558_p5 = pneg %p868_p0 }
  0x20   : > { %p562_p3 = scmp.lt.u32.totalorder %s864_s29, %s1044_s0  ;;  %p563_p10 = scmp.lt.u32.totalorder %s561_s26, %s556_s7 }
  0x21   : > { %p559_p6 = pnand %p558_p5, %p557_p4  ;;  %p565_p13 = scmp.lt.u32.totalorder %s556_s7, %s864_s29 }
  0x22   : > { %p564_p11 = por %p563_p10, %p562_p3 }
  0x23   : > { %p560_p7 = pneg %p559_p6 }
  0x24   : > { %p566_p1 = por %p565_p13, %p564_p11 }
  0x26   : > { %p567_p2 = pnand %p566_p1, %p560_p7 }
  0x28   : > { %570 = shalt.err (!%p567_p2)
}
  0x29   : > { %s571_s5 = scalar_lea.vmem %s859_s11, 64  ;;  %s746_s10 = smov [#allocation2]  }
  0x2a   : > { %p572_p4 = scmp.ne.s32.totalorder %s859_s11, %s571_s5  ;;  %s576_s25 = sshll.u32 %s746_s10, 4  ;;  %s577_s25 = int_to_ptr.vmem [resolvable:$false] %s576_s25 }
  0x2b   : > { %s578_s21 = scalar_lea.vmem %s577_s25, 128  ;;  %p579_p9 = scmp.lt.s32.totalorder %s859_s11, %s577_s25 }
  0x2c   : > { %p574_p6 = pnand %p572_p4, %p558_p5  ;;  %p580_p3 = scmp.lt.s32.totalorder %s578_s21, %s571_s5 }
  0x2e   : > { %p575_p12 = pneg %p574_p6  ;;  %p581_p10 = por %p580_p3, %p579_p9 }
  0x30   : > { %p582_p11 = pnand %p581_p10, %p575_p12 }
  0x32   : > { %585 = shalt.err (!%p582_p11)
}
  0x33   : > { %478 = dma.hbm_to_vmem [thread:$0]  (!%p868_p0), %s864_s29, 64, %s859_s11, %s166_s30  }
  0x34   : > { %p1057_p1 = scmp.lt.s32.totalorder %s744_s19, 5  ;;  %p1058_p2 = scmp.ge.s32.totalorder %s744_s19, 1 }
  0x36   : > { %p184_p5 = pnand %p1058_p2, %p1057_p1 }
  0x37   : > { %s904_s7 = sand.u32 (!%p184_p5), 1, %s720_s13  }
  0x38   : > { %187 = sbr.rel (%p184_p5) target bundleno = 151 (0x97), region = 24  ;;  %s458_s23 = sshll.u32 (!%p184_p5), %s904_s7, 2 }
  0x39   : > { %s190_s26 = scalar_lea.sflag (!%p184_p5), [#allocation3], %s904_s7  ;;  %s193_s8 = scalar_lea.vmem (!%p184_p5), [#allocation2], %s458_s23 }
  0x3f   : > { %703 = dma.done.wait (%p836_p8), %s190_s26, 64  }
  0x40   : > { %705 = vsyncadd (%p836_p8), %s190_s26, 4294967232  ;;  %v224_v0 = vlaneseq  ;;  %vm230_vm3 = vcmask 1043456   ;;  %v223_v2 = vld [vmem:[%s193_s8] sm:$0xf]  ;;  %s459_s11 = sshll.u32 %s732_s16, 1  ;;  %s210_s29 = scalar_lea.vmem [#allocation5], %s904_s7 }
  0x41   : > { %s278_s27 = sadd.s32 %s728_s15, %s459_s11  ;;  %s282_s24 = sshll.u32 %s210_s29, 4  ;;  %v747_v12 = vmov 0   ;;  %s918_s24 = int_to_ptr.vmem [resolvable:$true] %s282_s24 }
  0x42   : > { %v225_v1 = vshrl.u32 %v224_v0, 7  ;;  %s916_s30 = sshll.u32 %s278_s27, 4  ;;  %s260_s15 = scalar_lea.sflag [#allocation4], %s904_s7 }
  0x43   : > { %s924_s16 = scalar_lea.hbm %s1045_s1, %s916_s30  ;;  %s586_s10 = scalar_lea.vmem %s918_s24, 16 }
  0x44   : > { %vm226_vm0 = vcmp.ge.s32.totalorder %v225_v1, 1  ;;  %vm227_vm1 = vcmp.lt.s32.totalorder %v225_v1, 3  ;;  %p587_p8 = scmp.ne.s32.totalorder %s918_s24, %s586_s10  ;;  %p1059_p9 = scmp.ne.s32.totalorder %s1054_s28, 0 }
  0x45   : > { %vm228_vm2 = vmand %vm226_vm0, %vm227_vm1  ;;  %s748_s25 = smov [#allocation5]  }
  0x46   : > { %v229_v3 = vsel %vm228_vm2, %v223_v2, -inf  ;;  %p588_p12 = pnand %p587_p8, %p1059_p9  ;;  %s590_s21 = sshll.u32 %s748_s25, 4  ;;  %s591_s21 = int_to_ptr.vmem [resolvable:$false] %s590_s21 }
  0x47   : > { %v231_v4 = vsel %vm230_vm3, %v229_v3, -inf  ;;  %s592_s23 = scalar_lea.vmem %s591_s21, 32  ;;  %p593_p7 = scmp.lt.s32.totalorder %s918_s24, %s591_s21 }
  0x48   : > { %v232_v5 = vrot.slane %v231_v4, 4  ;;  %p589_p0 = pneg %p588_p12  ;;  %p594_p13 = scmp.lt.s32.totalorder %s592_s23, %s586_s10 }
  0x4a   : > { %v233_v6 = vmax.f32 %v231_v4, %v232_v5  ;;  %p595_p4 = por %p594_p13, %p593_p7 }
  0x4c   : > { %v234_v7 = vrot.slane %v233_v6, 2  ;;  %p596_p6 = pnand %p595_p4, %p589_p0 }
  0x4e   : > { %v235_v8 = vmax.f32 %v233_v6, %v234_v7 }
  0x50   : > { %v236_v9 = vrot.slane %v235_v8, 1 }
  0x52   : > { %v237_v10 = vmax.f32 %v235_v8, %v236_v9 }
  0x54   : > { %vm238_vm4 = vcmp.eq.f32.partialorder %v229_v3, %v237_v10  ;;  %256 = vst [vmem:[%s210_s29] sm:$0x1] %v237_v10  ;;  %vm254_vm5 = vcmp.ge.f32.partialorder %v237_v10, 0.5 }
  0x55   : > { %v239_v11 = vsel %vm238_vm4, %v225_v1, 4  ;;  %v255_v13 = vsel %vm254_vm5, 1, %v747_v12 }
  0x56   : > { %599 = shalt.err (!%p596_p6)
}
  0x57   : > { %s600_s26 = scalar_lea.hbm %s924_s16, 16  ;;  %s604_s27 = scalar_lea.hbm %s1045_s1, 64 }
  0x58   : > { %p601_p3 = scmp.ne.s32.totalorder %s924_s16, %s600_s26  ;;  %p605_p1 = scmp.lt.u32.totalorder %s924_s16, %s1045_s1 }
  0x59   : > { %p606_p2 = scmp.lt.u32.totalorder %s604_s27, %s600_s26  ;;  %p608_p8 = scmp.lt.u32.totalorder %s600_s26, %s924_s16 }
  0x5a   : > { %p602_p10 = pnand %p601_p3, %p1059_p9 }
  0x5b   : > { %p607_p5 = por %p606_p2, %p605_p1 }
  0x5c   : > { %p603_p11 = pneg %p602_p10 }
  0x5d   : > { %p609_p12 = por %p608_p8, %p607_p5 }
  0x5f   : > { %p610_p0 = pnand %p609_p12, %p603_p11 }
  0x61   : > { %613 = shalt.err (!%p610_p0)
}
  0x62   : > { %469 = dma.vmem_to_hbm [thread:$0]  (%p1059_p9), %s918_s24, 16, %s924_s16, %s260_s15   ;;  %v240_v14 = vsel %vm230_vm3, %v239_v11, 2147483647 }
  0x63   : > { %s222_s5 = scalar_lea.vmem [#allocation8], %s904_s7  ;;  %v241_v15 = vrot.slane %v240_v14, 4  ;;  %s216_s10 = scalar_lea.vmem [#allocation6], %s904_s7 }
  0x64   : > { %258 = vst [vmem:[%s222_s5] sm:$0x1] %v255_v13  ;;  %s297_s25 = sshll.u32 %s216_s10, 4  ;;  %s263_s21 = sand.u32 1, %s812_s20   ;;  %s952_s25 = int_to_ptr.vmem [resolvable:$true] %s297_s25 }
  0x65   : > { %vm242_vm6 = vcmp.lt.s32.totalorder %v240_v14, %v241_v15  ;;  %s312_s24 = sshll.u32 %s222_s5, 4  ;;  %s958_s23 = scalar_lea.hbm %s1046_s2, %s916_s30  ;;  %s960_s24 = int_to_ptr.vmem [resolvable:$true] %s312_s24 }
  0x66   : > { %v243_v16 = vsel %vm242_vm6, %v240_v14, %v241_v15  ;;  %s966_s20 = scalar_lea.hbm %s1047_s3, %s916_s30  ;;  %s968_s8 = scalar_lea.sflag [#allocation7], %s263_s21 }
  0x67   : > { %v244_v17 = vrot.slane %v243_v16, 2  ;;  %s614_s11 = scalar_lea.vmem %s952_s25, 16  ;;  %s749_s27 = smov [#allocation6]  }
  0x68   : > { %p615_p7 = scmp.ne.s32.totalorder %s952_s25, %s614_s11  ;;  %s618_s29 = sshll.u32 %s749_s27, 4  ;;  %s619_s29 = int_to_ptr.vmem [resolvable:$false] %s618_s29 }
  0x69   : > { %vm245_vm7 = vcmp.lt.s32.totalorder %v243_v16, %v244_v17  ;;  %s620_s9 = scalar_lea.vmem %s619_s29, 32  ;;  %p621_p6 = scmp.lt.s32.totalorder %s952_s25, %s619_s29 }
  0x6a   : > { %v246_v18 = vsel %vm245_vm7, %v243_v16, %v244_v17  ;;  %p616_p13 = pnand %p615_p7, %p1059_p9  ;;  %p622_p3 = scmp.lt.s32.totalorder %s620_s9, %s614_s11 }
  0x6b   : > { %v247_v19 = vrot.slane %v246_v18, 1 }
  0x6c   : > { %p617_p4 = pneg %p616_p13  ;;  %p623_p10 = por %p622_p3, %p621_p6 }
  0x6d   : > { %vm248_vm8 = vcmp.lt.s32.totalorder %v246_v18, %v247_v19 }
  0x6e   : > { %v249_v20 = vsel %vm248_vm8, %v246_v18, %v247_v19  ;;  %p624_p11 = pnand %p623_p10, %p617_p4 }
  0x6f   : > { %vm250_vm9 = vcmp.gt.s32.totalorder %v249_v20, 1 }
  0x70   : > { %v251_v21 = vsel %vm250_vm9, %v249_v20, 1 }
  0x71   : > { %vm252_vm10 = vcmp.lt.s32.totalorder %v251_v21, 2 }
  0x72   : > { %v253_v22 = vsel %vm252_vm10, %v251_v21, 2 }
  0x73   : > { %257 = vst [vmem:[%s216_s10] sm:$0x1] %v253_v22 }
  0x74   : > { %627 = shalt.err (!%p624_p11)
}
  0x75   : > { %s628_s30 = scalar_lea.hbm %s958_s23, 16  ;;  %s632_s21 = scalar_lea.hbm %s1046_s2, 64 }
  0x76   : > { %p629_p1 = scmp.ne.s32.totalorder %s958_s23, %s628_s30  ;;  %p633_p8 = scmp.lt.u32.totalorder %s958_s23, %s1046_s2 }
  0x77   : > { %p634_p12 = scmp.lt.u32.totalorder %s632_s21, %s628_s30  ;;  %p636_p7 = scmp.lt.u32.totalorder %s628_s30, %s958_s23 }
  0x78   : > { %p630_p2 = pnand %p629_p1, %p1059_p9 }
  0x79   : > { %p635_p0 = por %p634_p12, %p633_p8 }
  0x7a   : > { %p631_p5 = pneg %p630_p2 }
  0x7b   : > { %p637_p13 = por %p636_p7, %p635_p0 }
  0x7d   : > { %p638_p4 = pnand %p637_p13, %p631_p5 }
  0x7f   : > { %641 = shalt.err (!%p638_p4)
}
  0x80   : > { %470 = dma.vmem_to_hbm [thread:$0]  (%p1059_p9), %s952_s25, 16, %s958_s23, %s968_s8  }
  0x81   : > { %s642_s7 = scalar_lea.vmem %s960_s24, 16  ;;  %s750_s26 = smov [#allocation8]  }
  0x82   : > { %p643_p6 = scmp.ne.s32.totalorder %s960_s24, %s642_s7  ;;  %s646_s11 = sshll.u32 %s750_s26, 4  ;;  %s647_s11 = int_to_ptr.vmem [resolvable:$false] %s646_s11 }
  0x83   : > { %s648_s27 = scalar_lea.vmem %s647_s11, 32  ;;  %p649_p11 = scmp.lt.s32.totalorder %s960_s24, %s647_s11 }
  0x84   : > { %p644_p3 = pnand %p643_p6, %p1059_p9  ;;  %p650_p1 = scmp.lt.s32.totalorder %s648_s27, %s642_s7 }
  0x86   : > { %p645_p10 = pneg %p644_p3  ;;  %p651_p2 = por %p650_p1, %p649_p11 }
  0x88   : > { %p652_p5 = pnand %p651_p2, %p645_p10 }
  0x8a   : > { %655 = shalt.err (!%p652_p5)
}
  0x8b   : > { %s656_s25 = scalar_lea.hbm %s966_s20, 16  ;;  %s660_s9 = scalar_lea.hbm %s1047_s3, 64 }
  0x8c   : > { %p657_p8 = scmp.ne.s32.totalorder %s966_s20, %s656_s25  ;;  %p661_p7 = scmp.lt.u32.totalorder %s966_s20, %s1047_s3 }
  0x8d   : > { %p662_p13 = scmp.lt.u32.totalorder %s660_s9, %s656_s25  ;;  %p664_p6 = scmp.lt.u32.totalorder %s656_s25, %s966_s20 }
  0x8e   : > { %p658_p12 = pnand %p657_p8, %p1059_p9 }
  0x8f   : > { %p663_p4 = por %p662_p13, %p661_p7 }
  0x90   : > { %p659_p0 = pneg %p658_p12 }
  0x91   : > { %p665_p3 = por %p664_p6, %p663_p4 }
  0x93   : > { %p666_p10 = pnand %p665_p3, %p659_p0 }
  0x95   : > { %669 = shalt.err (!%p666_p10)
}
  0x96   : > { %471 = dma.vmem_to_hbm [thread:$0]  (%p1059_p9), %s960_s24, 16, %s966_s20, %s968_s8  }
  0x97 PF: > { %p490_p11 = scmp.ge.s32.totalorder %s744_s19, 2  ;;  %s324_s10 = sand.u32 1, %s716_s12  }
  0x98   : > { %p1060_p1 = scmp.ne.s32.totalorder %s1055_s4, 0  ;;  %s325_s21 = scalar_lea.sflag [#allocation4], %s324_s10 }
  0x9a   : > { %p480_p2 = pnand %p490_p11, %p1060_p1 }
  0x9c   : > { %707 = dma.done.wait (!%p480_p2), %s325_s21, 16  }
  0x9d   : > { %709 = vsyncadd (!%p480_p2), %s325_s21, 4294967280  ;;  %s1061_s16 = sadd.s32 4294967294, %s744_s19  }
  0x9e   : > { %s332_s15 = sand.u32 1, %s1061_s16  }
  0x9f   : > { %s333_s7 = scalar_lea.sflag [#allocation7], %s332_s15 }
  0xa0   : > { %711 = dma.done.wait (!%p480_p2), %s333_s7, 32  }
  0xa1   : > { %713 = vsyncadd (!%p480_p2), %s333_s7, 4294967264  ;;  %s23_s19 = sadd.s32 1, %s744_s19   ;;  %s1062_s28 = sld [smem:[#allocation12_spill]] }
  0xa2   : > { %p20_p9 = scmp.ge.s32.totalorder %s23_s19, 6   ;;  %s1063_s12 = smov %s720_s13 }
  0xa3   : > { %s1064_s13 = smov %s724_s14  ;;  %s1065_s14 = smov %s855_s6 }
  0xa4   : > { %s1066_s15 = smov %s736_s17  ;;  %s1067_s16 = smov %s740_s18 }
  0xa5   : > { %s1068_s17 = smov %s1071_s22  ;;  %22 = sbr.rel (!%p20_p9) target bundleno = 9 (0x9), region = 101 }
  0xa7   : > { %s1069_s18 = smov %s1062_s28 }
  0xac   :  { %345 = vsyncpa [#allocation3], 1 }
  0xad   :  { %347 = vsyncpa [#allocation3 + $0x1], 1 }
  0xae   :  { %348 = vsyncpa [#allocation4], 1 }
  0xaf   :  { %350 = vsyncpa [#allocation4 + $0x1], 1 }
  0xb0   :  { %351 = vsyncpa [#allocation7], 1 }
  0xb1   :  { %353 = vsyncpa [#allocation7 + $0x1], 1 }

</bundles_post_ra>
